<compile_context>
chip_gen: v5e
topology: v5e:2x2
jax: 0.10.0
libtpu: 0.0.40
codegen_flags: <defaults>
</compile_context>

<pallas_src>
import math
from typing import Optional, Sequence, Union

import jax
import jax.numpy as jnp
from jax.experimental import pallas as pl
from jax.experimental.pallas import tpu as pltpu


_TARGET_BLOCK_BYTES = 1 << 20  # ~1 MiB per pipelined block (safe on v5e/v6e/v7x)


def _concat_query_kernel(pos_ref, x_ref, o_ref):
    # pos_ref: (TS, C_pos)          trainable table tile (shared across batch)
    # x_ref:   (BN, TS, C_in)       inputs_without_pos tile (native dtype)
    # o_ref:   (BN, TS, C_in+C_pos) output tile
    bn = o_ref.shape[0]
    c_in = x_ref.shape[-1]
    # Two slab stores instead of jnp.concatenate (no relayout / temp array).
    o_ref[:, :, :c_in] = x_ref[...].astype(o_ref.dtype)
    o_ref[:, :, c_in:] = jnp.broadcast_to(
        pos_ref[...].astype(o_ref.dtype), (bn,) + pos_ref.shape
    )


def _broadcast_query_kernel(pos_ref, o_ref):
    # pos_ref: (1, 1, TF)  flattened, lane-dense table tile
    # o_ref:   (BN, 1, TF) output tile (broadcast over packed batch)
    o_ref[...] = jnp.broadcast_to(pos_ref[...], o_ref.shape)


def _choose_concat_tiles(n, s, out_row_bytes):
    """Pick (batch-pack BN, S-tile TS) targeting ~1 MiB output blocks."""
    rows = max(8, _TARGET_BLOCK_BYTES // max(out_row_bytes, 1))
    if rows >= s:
        ts = s                       # full-S block (== full dim, always legal)
    else:
        ts = max(8, (rows // 8) * 8)  # sublane-aligned S tile
    bn = min(n, max(1, _TARGET_BLOCK_BYTES // max(ts * out_row_bytes, 1)))
    return bn, ts


def _choose_flat_tiles(n, f, elem_bytes):
    """Pick (batch-pack BN, flat tile TF) for the lane-dense broadcast path."""
    if f * elem_bytes <= _TARGET_BLOCK_BYTES:
        tf = f                       # full flattened row (== full dim, legal)
    else:
        tf = max(128, ((_TARGET_BLOCK_BYTES // elem_bytes) // 128) * 128)
    bn = min(n, max(1, _TARGET_BLOCK_BYTES // max(tf * elem_bytes, 1)))
    return bn, tf


class BasicQueryPallas:
    """JAX/Pallas port of perceiver_io.output_queries.BasicQuery with a
    TRAINABLE position encoding."""

    def __init__(
        self,
        output_index_dims: Union[int, Sequence[int]],
        num_channels: int = 32,
        concat_preprocessed_input: bool = False,
        preprocessed_input_channels: Optional[int] = None,
        init_scale: float = 0.02,
        key: Optional[jax.Array] = None,
    ):
        if isinstance(output_index_dims, int):
            output_index_dims = (output_index_dims,)
        self._output_index_dims = tuple(output_index_dims)
        self._flat_index = int(math.prod(self._output_index_dims))
        self._concat_preprocessed_input = concat_preprocessed_input

        if key is None:
            key = jax.random.PRNGKey(0)
        # Trainable positional embedding table: [prod(index_dims), num_channels].
        self.pos_embs = (
            init_scale
            * jax.random.normal(key, (self._flat_index, num_channels), jnp.float32)
        )

        self._n_query_channels = num_channels
        if concat_preprocessed_input:
            assert preprocessed_input_channels is not None
            self._n_query_channels += preprocessed_input_channels
        self._preprocessed_input_channels = preprocessed_input_channels

    def n_query_channels(self):
        return self._n_query_channels

    def __call__(self, inputs, inputs_without_pos=None, subsampled_points=None):
        # TODO(synk): subsampled_points path (unravel_index + position re-encode)
        # is not implemented -- only the full-query TRAINABLE path is ported.
        assert subsampled_points is None
        n = inputs.shape[0]
        s, c_pos = self.pos_embs.shape
        pos_dtype = self.pos_embs.dtype

        if not self._concat_preprocessed_input:
            # Pure broadcast of the trainable table over the batch.  Flatten
            # (S, C_pos) so the output last dim is large / 128-aligned
            # (unmasked lane-dense stores); un-flatten in the wrapper (free).
            f = s * c_pos
            bn, tf = _choose_flat_tiles(n, f, jnp.dtype(pos_dtype).itemsize)
            pos_flat = self.pos_embs.reshape(1, 1, f)
            out = pl.pallas_call(
                _broadcast_query_kernel,
                out_shape=jax.ShapeDtypeStruct((n, 1, f), pos_dtype),
                grid=(pl.cdiv(n, bn), pl.cdiv(f, tf)),
                in_specs=[pl.BlockSpec((1, 1, tf), lambda i, j: (0, 0, j))],
                out_specs=pl.BlockSpec((bn, 1, tf), lambda i, j: (i, 0, j)),
                compiler_params=pltpu.CompilerParams(
                    dimension_semantics=("parallel", "parallel")
                ),
            )(pos_flat)
            return out.reshape(n, s, c_pos)

        if inputs_without_pos is None:
            raise ValueError(
                "Value is required for inputs_without_pos if "
                "concat_preprocessed_input is True"
            )
        c_in = inputs_without_pos.shape[-1]
        assert inputs_without_pos.shape == (n, s, c_in)
        c_out = c_in + c_pos
        # Promote like torch.cat; cast happens inside the kernel (no extra
        # wrapper-side HBM round trip for the input).
        out_dtype = jnp.result_type(inputs_without_pos.dtype, pos_dtype)
        out_row_bytes = c_out * jnp.dtype(out_dtype).itemsize
        bn, ts = _choose_concat_tiles(n, s, out_row_bytes)

        return pl.pallas_call(
            _concat_query_kernel,
            out_shape=jax.ShapeDtypeStruct((n, s, c_out), out_dtype),
            grid=(pl.cdiv(n, bn), pl.cdiv(s, ts)),
            in_specs=[
                pl.BlockSpec((ts, c_pos), lambda i, j: (j, 0)),        # shared table tile
                pl.BlockSpec((bn, ts, c_in), lambda i, j: (i, j, 0)),  # batch tile (native dtype)
            ],
            out_specs=pl.BlockSpec((bn, ts, c_out), lambda i, j: (i, j, 0)),
            compiler_params=pltpu.CompilerParams(
                dimension_semantics=("parallel", "parallel")
            ),
        )(self.pos_embs, inputs_without_pos)


if __name__ == "__main__":
    key = jax.random.PRNGKey(0)
    k_pos, k_in, k_inwp = jax.random.split(key, 3)

    N = 2          # batch
    S = 8          # output_index_dims (flattened query length)
    C_POS = 32     # trainable position-encoding channels
    C_IN = 32      # preprocessed_input_channels

    module = BasicQueryPallas(
        output_index_dims=S,
        num_channels=C_POS,
        concat_preprocessed_input=True,
        preprocessed_input_channels=C_IN,
        key=k_pos,
    )

    # `inputs` only contributes its batch size on this path.
    inputs = jax.random.normal(k_in, (N, S, 16), jnp.float32)
    inputs_without_pos = jax.random.normal(k_inwp, (N, S, C_IN), jnp.float32)

    out = jax.block_until_ready(module(inputs, inputs_without_pos=inputs_without_pos))
    ref = jnp.concatenate(
        [inputs_without_pos, jnp.broadcast_to(module.pos_embs[None], (N, S, C_POS))],
        axis=-1,
    )
    assert out.shape == (N, S, C_IN + C_POS)
    assert out.dtype == jnp.float32
    assert jnp.allclose(out, ref, atol=1e-6, rtol=1e-6)

    # Native bf16 input: no wrapper-side astype, widened on load inside the kernel.
    x_bf16 = inputs_without_pos.astype(jnp.bfloat16)
    out_bf = jax.block_until_ready(module(inputs, inputs_without_pos=x_bf16))
    ref_bf = jnp.concatenate(
        [x_bf16.astype(jnp.float32),
         jnp.broadcast_to(module.pos_embs[None], (N, S, C_POS))],
        axis=-1,
    )
    assert out_bf.dtype == jnp.float32
    assert jnp.allclose(out_bf, ref_bf, atol=1e-6, rtol=1e-6)

    # Broadcast-only (no concat) path: lane-dense flattened output.
    module2 = BasicQueryPallas(output_index_dims=S, num_channels=C_POS, key=k_pos)
    out2 = jax.block_until_ready(module2(inputs))
    assert out2.shape == (N, S, C_POS)
    assert jnp.allclose(
        out2, jnp.broadcast_to(module2.pos_embs[None], (N, S, C_POS)), atol=1e-6
    )

    print("KERNEL_OK")
</pallas_src>

<mosaic_0001>
module attributes {stable_mosaic.version = 11 : i64} {
  func.func @_concat_query_kernel(%arg0: i32, %arg1: i32, %arg2: memref<8x32xf32, #tpu.memory_space<vmem>>, %arg3: memref<2x8x32xf32, #tpu.memory_space<vmem>>, %arg4: memref<2x8x64xf32, #tpu.memory_space<vmem>>) attributes {dimension_semantics = [#tpu.dimension_semantics<parallel>, #tpu.dimension_semantics<parallel>], iteration_bounds = array<i64: 1, 1>, scalar_prefetch = 0 : i64, scratch_operands = 0 : i64, tpu.core_type = #tpu.core_type<tc>, window_params = [{transform_indices = @transform_0, window_bounds = array<i64: 8, 32>}, {transform_indices = @transform_1, window_bounds = array<i64: 2, 8, 32>}, {transform_indices = @transform_2, window_bounds = array<i64: 2, 8, 64>}]} {
    %c0 = arith.constant 0 : index
    %c0_0 = arith.constant 0 : index
    %c0_1 = arith.constant 0 : index
    %0 = vector.load %arg3[%c0, %c0_0, %c0_1] : memref<2x8x32xf32, #tpu.memory_space<vmem>>, vector<2x8x32xf32>
    %c0_2 = arith.constant 0 : index
    %c0_3 = arith.constant 0 : index
    %c0_4 = arith.constant 0 : index
    %1 = vector.load %arg4[%c0_2, %c0_3, %c0_4] : memref<2x8x64xf32, #tpu.memory_space<vmem>>, vector<2x8x32xf32>
    tpu.vector_store %arg4[%c0_2, %c0_3, %c0_4], %0 {strides = array<i32>} : memref<2x8x64xf32, #tpu.memory_space<vmem>>, vector<2x8x32xf32>,
    %c0_5 = arith.constant 0 : index
    %c0_6 = arith.constant 0 : index
    %2 = vector.load %arg2[%c0_5, %c0_6] : memref<8x32xf32, #tpu.memory_space<vmem>>, vector<8x32xf32>
    %3 = vector.shape_cast %2 : vector<8x32xf32> to vector<1x8x32xf32>
    %4 = vector.broadcast %3 : vector<1x8x32xf32> to vector<2x8x32xf32>
    %c0_7 = arith.constant 0 : index
    %c0_8 = arith.constant 0 : index
    %c32 = arith.constant 32 : index
    %5 = vector.load %arg4[%c0_7, %c0_8, %c32] : memref<2x8x64xf32, #tpu.memory_space<vmem>>, vector<2x8x32xf32>
    tpu.vector_store %arg4[%c0_7, %c0_8, %c32], %4 {strides = array<i32>} : memref<2x8x64xf32, #tpu.memory_space<vmem>>, vector<2x8x32xf32>,
    return
  }
  func.func @transform_0(%arg0: i32, %arg1: i32) -> (i32, i32) {
    %c0_i32 = arith.constant 0 : i32
    %c0_i32_0 = arith.constant 0 : i32
    return %arg1, %c0_i32 : i32, i32
  }
  func.func @transform_1(%arg0: i32, %arg1: i32) -> (i32, i32, i32) {
    %c0_i32 = arith.constant 0 : i32
    %c0_i32_0 = arith.constant 0 : i32
    return %arg0, %arg1, %c0_i32 : i32, i32, i32
  }
  func.func @transform_2(%arg0: i32, %arg1: i32) -> (i32, i32, i32) {
    %c0_i32 = arith.constant 0 : i32
    %c0_i32_0 = arith.constant 0 : i32
    return %arg0, %arg1, %c0_i32 : i32, i32, i32
  }
}

</mosaic_0001>

<bundles_post_ra>
// kernel: tpu_custom_call.1
= control target key start
LH: loop header
LB: loop body
LE: loop exit
PB: predicated region body
PF: predicated region fallthrough
CT: control target
= control target key end

     0   :  { %7 = vsyncpa [#allocation3], 0  ;;  %s189_s0 = inlined_call_operand.hbm [shape: f32[8,32], index: 0, kind: input, shape index: {}]   ;;  %s190_s1 = inlined_call_operand.hbm [shape: f32[2,8,32], index: 1, kind: input, shape index: {}]   ;;  %s191_s2 = inlined_call_operand.hbm [shape: f32[2,8,64], index: 2, kind: output, shape index: {}]  }
   0x1   :  { %8 = vsyncpa [#allocation6], 0 }
   0x2   :  { %9 = vsyncpa [#allocation4], 0  ;;  %s15_s11 = sshll.u32 %s189_s0, 4  ;;  %s159_s12 = smov [#allocation2]   ;;  %s16_s11 = int_to_ptr.hbm [resolvable:$true] %s15_s11 }
   0x3   :  { %s17_s13 = sshll.u32 %s159_s12, 4  ;;  %s25_s16 = sshll.u32 %s190_s1, 4  ;;  %s18_s13 = int_to_ptr.vmem [resolvable:$true] %s17_s13  ;;  %s26_s16 = int_to_ptr.hbm [resolvable:$true] %s25_s16 }
   0x4   :  { %20 = dma.hbm_to_vmem [thread:$0]  %s16_s11, 128, %s18_s13, [#allocation3]  }
   0x5   :  { %s160_s17 = smov [#allocation5]   ;;  %s161_s19 = smov 128  }
   0x6   :  { %s27_s18 = sshll.u32 %s160_s17, 4  ;;  %s162_s20 = smov 8   ;;  %s28_s18 = int_to_ptr.vmem [resolvable:$true] %s27_s18 }
   0x7   :  { %33 = dma.hbm_to_vmem [thread:$0]  %s26_s16, 256, %s28_s18, [#allocation6], %s161_s19, %s161_s19, %s162_s20  }
   0x8   :  { %153 = dma.done.wait [#allocation3], 128  }
   0x9   :  { %154 = vsyncadd [#allocation3], 4294967168 }
   0xa   :  { %155 = dma.done.wait [#allocation6], 256  }
   0xb   :  { %156 = vsyncadd [#allocation6], 4294967040  ;;  %vm44_vm0 = vcmask 261120   ;;  %v47_v0 = vld [vmem:[#allocation2] sm:$0xff]  ;;  %v42_v1 = vld [vmem:[#allocation5] sm:$0xff]  ;;  %s163_s0 = smov 32  }
   0xc   :  { %v43_v2 = vld [vmem:[#allocation5 + $0x8] sm:$0xff]  ;;  %49 = vrot.lane.b32.xlu0 %v47_v0, %s163_s0  ;;  %45 = vst.msk [vmem:[#allocation7] sm:$0xff] %vm44_vm0, %v42_v1  ;;  %s164_s1 = smov [#allocation7]   ;;  %s61_s24 = sshll.u32 %s191_s2, 4  ;;  %vm52_vm1 = vcmask 523520   ;;  %s62_s24 = int_to_ptr.hbm [resolvable:$true] %s61_s24 }
   0xd   :  { %46 = vst.msk [vmem:[#allocation7 + $0x8] sm:$0xff] %vm44_vm0, %v43_v2  ;;  %s59_s21 = sshll.u32 %s164_s1, 4  ;;  %s60_s21 = int_to_ptr.vmem [resolvable:$true] %s59_s21 }
  0x7e   :  { %v50_v3 = vpop.permute.xlu0 %49 }
  0x7f   :  { %53 = vst.msk [vmem:[#allocation7] sm:$0xff] %vm52_vm1, %v50_v3 }
  0x80   :  { %54 = vst.msk [vmem:[#allocation7 + $0x8] sm:$0xff] %vm52_vm1, %v50_v3 }
  0x81   :  { %67 = dma.vmem_to_hbm [thread:$0]  %s60_s21, 256, %s62_s24, [#allocation4], %s161_s19, %s161_s19, %s162_s20  }
  0x82   :  { %157 = dma.done.wait [#allocation4], 256  }
  0x83   :  { %158 = vsyncadd [#allocation4], 4294967040 }
  0x84   :  { %72 = vsyncpa [#allocation3], 1 }
  0x85   :  { %73 = vsyncpa [#allocation6], 1 }
  0x86   :  { %74 = vsyncpa [#allocation4], 1 }

</bundles_post_ra>
